<compile_context>
chip_gen: v5e
topology: v5e:2x2
jax: 0.10.0
libtpu: 0.0.40
codegen_flags: <defaults>
</compile_context>

<pallas_src>
import jax
import jax.numpy as jnp
from jax.experimental import pallas as pl
from jax.experimental.pallas import tpu as pltpu  # noqa: F401  (TPU backend)


def _round_up(x, m):
    return ((x + m - 1) // m) * m


def pack_params(params, lane=128, sublane=8):
    """Pack raw Policy_SAC parameters into one 8-row-aligned (rows, lane) slab."""
    w1, b1, w2, b2, g1, be1, g2, be2, wmu, bmu, wstd, bstd = params
    del b1, b2  # exactly cancelled by batch-stat BatchNorm's mean subtraction

    S, F1 = w1.shape
    F2 = w2.shape[1]
    A = wmu.shape[1]
    Apad = max(lane, _round_up(2 * A, lane))
    LW = max(_round_up(F1, lane), _round_up(F2, lane), Apad)

    r_w1 = _round_up(S, sublane)      # W1 rows
    r_bn = sublane                    # 4 BN rows + pad
    r_bh = sublane                    # 1 fused-head-bias row + pad
    r_w2 = _round_up(F1, sublane)     # W2 rows
    r_wh = _round_up(F2, sublane)     # fused head weight rows

    o_w1 = 0
    o_bn = o_w1 + r_w1
    o_bh = o_bn + r_bn
    o_w2 = o_bh + r_bh
    o_wh = o_w2 + r_w2
    total = o_wh + r_wh

    slab = jnp.zeros((total, LW), jnp.float32)
    slab = slab.at[o_w1:o_w1 + S, :F1].set(w1.astype(jnp.float32))
    slab = slab.at[o_bn + 0, :F1].set(g1.reshape(-1).astype(jnp.float32))
    slab = slab.at[o_bn + 1, :F1].set(be1.reshape(-1).astype(jnp.float32))
    slab = slab.at[o_bn + 2, :F2].set(g2.reshape(-1).astype(jnp.float32))
    slab = slab.at[o_bn + 3, :F2].set(be2.reshape(-1).astype(jnp.float32))
    slab = slab.at[o_bh, :A].set(bmu.reshape(-1).astype(jnp.float32))
    slab = slab.at[o_bh, A:2 * A].set(bstd.reshape(-1).astype(jnp.float32))
    slab = slab.at[o_w2:o_w2 + F1, :F2].set(w2.astype(jnp.float32))
    slab = slab.at[o_wh:o_wh + F2, :A].set(wmu.astype(jnp.float32))
    slab = slab.at[o_wh:o_wh + F2, A:2 * A].set(wstd.astype(jnp.float32))

    layout = dict(S=S, F1=F1, F2=F2, A=A, Apad=Apad, LW=LW, total=total,
                  o_w1=o_w1, o_bn=o_bn, o_bh=o_bh, o_w2=o_w2, o_wh=o_wh)
    return slab, layout


def policy_sac_forward(state, slab, layout, log_std_min=-20.0, log_std_max=2.0):
    """state: (B, state_size) f32. Returns (mean, log_std), each (B, action_size)."""
    B, S = state.shape
    F1, F2, A = layout["F1"], layout["F2"], layout["A"]
    Apad, LW, total = layout["Apad"], layout["LW"], layout["total"]
    o_w1, o_bn, o_bh = layout["o_w1"], layout["o_bn"], layout["o_bh"]
    o_w2, o_wh = layout["o_w2"], layout["o_wh"]
    eps = 1e-5
    lo = float(log_std_min)
    hi = float(log_std_max)

    def kernel(state_ref, slab_ref, out_ref):
        x = state_ref[...]                                           # (B, S) f32

        # ---- fc1 (bias cancelled by BN) + folded BN1 + relu ----
        w1 = slab_ref[o_w1:o_w1 + S, 0:F1]
        h = jnp.dot(x, w1, preferred_element_type=jnp.float32)
        mu1 = jnp.mean(h, axis=0, keepdims=True)
        d1 = h - mu1
        var1 = jnp.mean(d1 * d1, axis=0, keepdims=True)              # two-pass (stable)
        scale1 = slab_ref[o_bn + 0:o_bn + 1, 0:F1] * jax.lax.rsqrt(var1 + eps)
        shift1 = slab_ref[o_bn + 1:o_bn + 2, 0:F1] - mu1 * scale1
        h = jnp.maximum(h * scale1 + shift1, 0.0)

        # ---- fc2 (bias cancelled by BN) + folded BN2 + relu ----
        w2 = slab_ref[o_w2:o_w2 + F1, 0:F2]
        h2 = jnp.dot(h, w2, preferred_element_type=jnp.float32)
        mu2 = jnp.mean(h2, axis=0, keepdims=True)
        d2 = h2 - mu2
        var2 = jnp.mean(d2 * d2, axis=0, keepdims=True)
        scale2 = slab_ref[o_bn + 2:o_bn + 3, 0:F2] * jax.lax.rsqrt(var2 + eps)
        shift2 = slab_ref[o_bn + 3:o_bn + 4, 0:F2] - mu2 * scale2
        h2 = jnp.maximum(h2 * scale2 + shift2, 0.0)

        # ---- fused, lane-padded heads: [mean | log_std | 0-pad] + in-kernel clamp ----
        whead = slab_ref[o_wh:o_wh + F2, 0:Apad]
        bhead = slab_ref[o_bh:o_bh + 1, 0:Apad]
        y = jnp.dot(h2, whead, preferred_element_type=jnp.float32) + bhead
        lane_idx = jax.lax.broadcasted_iota(jnp.int32, y.shape, 1)
        is_std = (lane_idx >= A) & (lane_idx < 2 * A)
        out_ref[...] = jnp.where(is_std, jnp.clip(y, lo, hi), y)

    def full_spec(shape):
        # one block == whole array
        return pl.BlockSpec(shape, lambda: (0,) * len(shape))

    flops = 2 * B * (S * F1 + F1 * F2 + F2 * Apad)
    bytes_accessed = 4 * (B * S + total * LW + B * Apad)
    cost = pl.CostEstimate(flops=flops,
                           transcendentals=F1 + F2,
                           bytes_accessed=bytes_accessed)

    out = pl.pallas_call(
        kernel,
        grid=(),
        in_specs=[full_spec((B, S)), full_spec((total, LW))],
        out_specs=full_spec((B, Apad)),
        out_shape=jax.ShapeDtypeStruct((B, Apad), jnp.float32),
        cost_estimate=cost,
    )(state, slab)

    mean = out[:, :A]
    log_std = out[:, A:2 * A]          # already clamped in-kernel
    return mean, log_std


def init_params(key, state_size, fc1_size, fc2_size, action_size, init_w=0.003):
    ks = jax.random.split(key, 8)

    def linear_init(kw, kb, fan_in, fan_out):
        bound = 1.0 / jnp.sqrt(fan_in)
        w = jax.random.uniform(kw, (fan_in, fan_out), jnp.float32, -bound, bound)
        b = jax.random.uniform(kb, (1, fan_out), jnp.float32, -bound, bound)
        return w, b

    w1, b1 = linear_init(ks[0], ks[1], state_size, fc1_size)
    w2, b2 = linear_init(ks[2], ks[3], fc1_size, fc2_size)
    # fc3 heads: uniform(-init_w, init_w)
    wmu = jax.random.uniform(ks[4], (fc2_size, action_size), jnp.float32, -init_w, init_w)
    bmu = jax.random.uniform(ks[5], (1, action_size), jnp.float32, -init_w, init_w)
    wstd = jax.random.uniform(ks[6], (fc2_size, action_size), jnp.float32, -init_w, init_w)
    bstd = jax.random.uniform(ks[7], (1, action_size), jnp.float32, -init_w, init_w)
    # BatchNorm affine params (default init: gamma=1, beta=0)
    g1 = jnp.ones((1, fc1_size), jnp.float32)
    be1 = jnp.zeros((1, fc1_size), jnp.float32)
    g2 = jnp.ones((1, fc2_size), jnp.float32)
    be2 = jnp.zeros((1, fc2_size), jnp.float32)
    return (w1, b1, w2, b2, g1, be1, g2, be2, wmu, bmu, wstd, bstd)


def reference_forward(state, params):
    """Pure-JAX mirror of the PyTorch module (train mode, with fc biases)."""
    eps = 1e-5
    w1, b1, w2, b2, g1, be1, g2, be2, wmu, bmu, wstd, bstd = params
    h = state @ w1 + b1
    mu = h.mean(0, keepdims=True)
    var = ((h - mu) ** 2).mean(0, keepdims=True)
    h = jnp.maximum((h - mu) / jnp.sqrt(var + eps) * g1 + be1, 0.0)
    h2 = h @ w2 + b2
    mu2 = h2.mean(0, keepdims=True)
    var2 = ((h2 - mu2) ** 2).mean(0, keepdims=True)
    h2 = jnp.maximum((h2 - mu2) / jnp.sqrt(var2 + eps) * g2 + be2, 0.0)
    mean = h2 @ wmu + bmu
    log_std = jnp.clip(h2 @ wstd + bstd, -20.0, 2.0)
    return mean, log_std


if __name__ == "__main__":
    key = jax.random.PRNGKey(0)
    k_state, k_params = jax.random.split(key)

    B = 8            # batch (>1 required for batch-stat BatchNorm, as in PyTorch)
    STATE = 16       # state_size
    FC1 = 128        # fc1_size (module default)
    FC2 = 128        # fc2_size (module default)
    ACTION = 1       # action_size (module default)

    state = jax.random.normal(k_state, (B, STATE), jnp.float32)
    params = init_params(k_params, STATE, FC1, FC2, ACTION)
    slab, layout = pack_params(params)

    mean, log_std = policy_sac_forward(state, slab, layout)
    jax.block_until_ready((mean, log_std))

    ref_mean, ref_log_std = reference_forward(state, params)
    assert mean.shape == (B, ACTION) and log_std.shape == (B, ACTION)
    assert jnp.allclose(mean, ref_mean, atol=1e-4, rtol=1e-4)
    assert jnp.allclose(log_std, ref_log_std, atol=1e-4, rtol=1e-4)

    print("KERNEL_OK")
</pallas_src>

<mosaic_0001>
module attributes {stable_mosaic.version = 11 : i64} {
  func.func @kernel(%arg0: memref<8x16xf32, #tpu.memory_space<vmem>>, %arg1: memref<288x128xf32, #tpu.memory_space<vmem>>, %arg2: memref<8x128xf32, #tpu.memory_space<vmem>>) attributes {dimension_semantics = [], scalar_prefetch = 0 : i64, scratch_operands = 0 : i64, tpu.core_type = #tpu.core_type<tc>} {
    %c0 = arith.constant 0 : index
    %c0_0 = arith.constant 0 : index
    %0 = vector.load %arg0[%c0, %c0_0] : memref<8x16xf32, #tpu.memory_space<vmem>>, vector<8x16xf32>
    %c0_1 = arith.constant 0 : index
    %c0_2 = arith.constant 0 : index
    %1 = vector.load %arg1[%c0_1, %c0_2] : memref<288x128xf32, #tpu.memory_space<vmem>>, vector<16x128xf32>
    %cst = arith.constant dense<0.000000e+00> : vector<8x128xf32>
    %2 = tpu.matmul %0, %1, %cst {dimension_numbers = #tpu.dot_dimension_numbers<[1], [0], [0], [1], [0, 0, 1, 1], [], []>} : vector<8x16xf32>, vector<16x128xf32>, vector<8x128xf32> -> vector<8x128xf32>
    %cst_3 = arith.constant dense<0.000000e+00> : vector<128xf32>
    %3 = vector.multi_reduction <add>, %2, %cst_3 [0] : vector<8x128xf32> to vector<128xf32>
    %4 = vector.shape_cast %3 : vector<128xf32> to vector<1x128xf32>
    %cst_4 = arith.constant 8.000000e+00 : f32
    %5 = vector.broadcast %cst_4 : f32 to vector<1x128xf32>
    %6 = arith.divf %4, %5 : vector<1x128xf32>
    %7 = vector.broadcast %6 : vector<1x128xf32> to vector<8x128xf32>
    %8 = arith.subf %2, %7 : vector<8x128xf32>
    %9 = arith.mulf %8, %8 : vector<8x128xf32>
    %cst_5 = arith.constant dense<0.000000e+00> : vector<128xf32>
    %10 = vector.multi_reduction <add>, %9, %cst_5 [0] : vector<8x128xf32> to vector<128xf32>
    %11 = vector.shape_cast %10 : vector<128xf32> to vector<1x128xf32>
    %cst_6 = arith.constant 8.000000e+00 : f32
    %12 = vector.broadcast %cst_6 : f32 to vector<1x128xf32>
    %13 = arith.divf %11, %12 : vector<1x128xf32>
    %c16 = arith.constant 16 : index
    %c0_7 = arith.constant 0 : index
    %14 = vector.load %arg1[%c16, %c0_7] : memref<288x128xf32, #tpu.memory_space<vmem>>, vector<1x128xf32>
    %cst_8 = arith.constant 9.99999974E-6 : f32
    %15 = vector.broadcast %cst_8 : f32 to vector<1x128xf32>
    %16 = arith.addf %13, %15 : vector<1x128xf32>
    %17 = math.rsqrt %16 : vector<1x128xf32>
    %18 = arith.mulf %14, %17 : vector<1x128xf32>
    %c17 = arith.constant 17 : index
    %c0_9 = arith.constant 0 : index
    %19 = vector.load %arg1[%c17, %c0_9] : memref<288x128xf32, #tpu.memory_space<vmem>>, vector<1x128xf32>
    %20 = arith.mulf %6, %18 : vector<1x128xf32>
    %21 = arith.subf %19, %20 : vector<1x128xf32>
    %22 = vector.broadcast %18 : vector<1x128xf32> to vector<8x128xf32>
    %23 = arith.mulf %2, %22 : vector<8x128xf32>
    %24 = vector.broadcast %21 : vector<1x128xf32> to vector<8x128xf32>
    %25 = arith.addf %23, %24 : vector<8x128xf32>
    %cst_10 = arith.constant 0.000000e+00 : f32
    %26 = vector.broadcast %cst_10 : f32 to vector<8x128xf32>
    %27 = arith.maximumf %25, %26 : vector<8x128xf32>
    %c32 = arith.constant 32 : index
    %c0_11 = arith.constant 0 : index
    %28 = vector.load %arg1[%c32, %c0_11] : memref<288x128xf32, #tpu.memory_space<vmem>>, vector<128x128xf32>
    %cst_12 = arith.constant dense<0.000000e+00> : vector<8x128xf32>
    %29 = tpu.matmul %27, %28, %cst_12 {dimension_numbers = #tpu.dot_dimension_numbers<[1], [0], [0], [1], [0, 0, 1, 1], [], []>} : vector<8x128xf32>, vector<128x128xf32>, vector<8x128xf32> -> vector<8x128xf32>
    %cst_13 = arith.constant dense<0.000000e+00> : vector<128xf32>
    %30 = vector.multi_reduction <add>, %29, %cst_13 [0] : vector<8x128xf32> to vector<128xf32>
    %31 = vector.shape_cast %30 : vector<128xf32> to vector<1x128xf32>
    %cst_14 = arith.constant 8.000000e+00 : f32
    %32 = vector.broadcast %cst_14 : f32 to vector<1x128xf32>
    %33 = arith.divf %31, %32 : vector<1x128xf32>
    %34 = vector.broadcast %33 : vector<1x128xf32> to vector<8x128xf32>
    %35 = arith.subf %29, %34 : vector<8x128xf32>
    %36 = arith.mulf %35, %35 : vector<8x128xf32>
    %cst_15 = arith.constant dense<0.000000e+00> : vector<128xf32>
    %37 = vector.multi_reduction <add>, %36, %cst_15 [0] : vector<8x128xf32> to vector<128xf32>
    %38 = vector.shape_cast %37 : vector<128xf32> to vector<1x128xf32>
    %cst_16 = arith.constant 8.000000e+00 : f32
    %39 = vector.broadcast %cst_16 : f32 to vector<1x128xf32>
    %40 = arith.divf %38, %39 : vector<1x128xf32>
    %c18 = arith.constant 18 : index
    %c0_17 = arith.constant 0 : index
    %41 = vector.load %arg1[%c18, %c0_17] : memref<288x128xf32, #tpu.memory_space<vmem>>, vector<1x128xf32>
    %cst_18 = arith.constant 9.99999974E-6 : f32
    %42 = vector.broadcast %cst_18 : f32 to vector<1x128xf32>
    %43 = arith.addf %40, %42 : vector<1x128xf32>
    %44 = math.rsqrt %43 : vector<1x128xf32>
    %45 = arith.mulf %41, %44 : vector<1x128xf32>
    %c19 = arith.constant 19 : index
    %c0_19 = arith.constant 0 : index
    %46 = vector.load %arg1[%c19, %c0_19] : memref<288x128xf32, #tpu.memory_space<vmem>>, vector<1x128xf32>
    %47 = arith.mulf %33, %45 : vector<1x128xf32>
    %48 = arith.subf %46, %47 : vector<1x128xf32>
    %49 = vector.broadcast %45 : vector<1x128xf32> to vector<8x128xf32>
    %50 = arith.mulf %29, %49 : vector<8x128xf32>
    %51 = vector.broadcast %48 : vector<1x128xf32> to vector<8x128xf32>
    %52 = arith.addf %50, %51 : vector<8x128xf32>
    %cst_20 = arith.constant 0.000000e+00 : f32
    %53 = vector.broadcast %cst_20 : f32 to vector<8x128xf32>
    %54 = arith.maximumf %52, %53 : vector<8x128xf32>
    %c160 = arith.constant 160 : index
    %c0_21 = arith.constant 0 : index
    %55 = vector.load %arg1[%c160, %c0_21] : memref<288x128xf32, #tpu.memory_space<vmem>>, vector<128x128xf32>
    %c24 = arith.constant 24 : index
    %c0_22 = arith.constant 0 : index
    %56 = vector.load %arg1[%c24, %c0_22] : memref<288x128xf32, #tpu.memory_space<vmem>>, vector<1x128xf32>
    %cst_23 = arith.constant dense<0.000000e+00> : vector<8x128xf32>
    %57 = tpu.matmul %54, %55, %cst_23 {dimension_numbers = #tpu.dot_dimension_numbers<[1], [0], [0], [1], [0, 0, 1, 1], [], []>} : vector<8x128xf32>, vector<128x128xf32>, vector<8x128xf32> -> vector<8x128xf32>
    %58 = vector.broadcast %56 : vector<1x128xf32> to vector<8x128xf32>
    %59 = arith.addf %57, %58 : vector<8x128xf32>
    %60 = tpu.iota {dimensions = array<i32: 1>} : vector<8x128xi32>
    %c1_i32 = arith.constant 1 : i32
    %61 = vector.broadcast %c1_i32 : i32 to vector<8x128xi32>
    %62 = arith.cmpi sge, %60, %61 : vector<8x128xi32>
    %c2_i32 = arith.constant 2 : i32
    %63 = vector.broadcast %c2_i32 : i32 to vector<8x128xi32>
    %64 = arith.cmpi slt, %60, %63 : vector<8x128xi32>
    %65 = arith.andi %62, %64 : vector<8x128xi1>
    %cst_24 = arith.constant -2.000000e+01 : f32
    %cst_25 = arith.constant 2.000000e+00 : f32
    %66 = vector.broadcast %cst_24 : f32 to vector<8x128xf32>
    %67 = arith.maximumf %66, %59 : vector<8x128xf32>
    %68 = vector.broadcast %cst_25 : f32 to vector<8x128xf32>
    %69 = arith.minimumf %68, %67 : vector<8x128xf32>
    %70 = arith.select %65, %69, %59 : vector<8x128xi1>, vector<8x128xf32>
    %c0_26 = arith.constant 0 : index
    %c0_27 = arith.constant 0 : index
    %71 = vector.load %arg2[%c0_26, %c0_27] : memref<8x128xf32, #tpu.memory_space<vmem>>, vector<8x128xf32>
    tpu.vector_store %arg2[%c0_26, %c0_27], %70 {strides = array<i32>} : memref<8x128xf32, #tpu.memory_space<vmem>>, vector<8x128xf32>,
    return
  }
}

</mosaic_0001>

<bundles_post_ra>
// kernel: tpu_custom_call.1
= control target key start
LH: loop header
LB: loop body
LE: loop exit
PB: predicated region body
PF: predicated region fallthrough
CT: control target
= control target key end

     0   :  { %7 = vsyncpa [#allocation3], 0  ;;  %s391_s0 = inlined_call_operand.hbm [shape: f32[8,16], index: 0, kind: input, shape index: {}]   ;;  %s392_s1 = inlined_call_operand.hbm [shape: f32[288,128], index: 1, kind: input, shape index: {}]   ;;  %s393_s2 = inlined_call_operand.hbm [shape: f32[8,128], index: 2, kind: output, shape index: {}]  }
   0x1   :  { %8 = vsyncpa [#allocation6], 0 }
   0x2   :  { %9 = vsyncpa [#allocation4], 0  ;;  %s15_s11 = sshll.u32 %s391_s0, 4  ;;  %s343_s12 = smov [#allocation2]   ;;  %s16_s11 = int_to_ptr.hbm [resolvable:$true] %s15_s11 }
   0x3   :  { %s17_s13 = sshll.u32 %s343_s12, 4  ;;  %s25_s16 = sshll.u32 %s392_s1, 4  ;;  %s18_s13 = int_to_ptr.vmem [resolvable:$true] %s17_s13  ;;  %s26_s16 = int_to_ptr.hbm [resolvable:$true] %s25_s16 }
   0x4   :  { %20 = dma.hbm_to_vmem [thread:$0]  %s16_s11, 128, %s18_s13, [#allocation3]  }
   0x5   :  { %s344_s17 = smov [#allocation5]   ;;  %s345_s19 = smov 128  }
   0x6   :  { %s27_s18 = sshll.u32 %s344_s17, 4  ;;  %s346_s20 = smov 8   ;;  %s28_s18 = int_to_ptr.vmem [resolvable:$true] %s27_s18 }
   0x7   :  { %33 = dma.hbm_to_vmem [thread:$0]  %s26_s16, 4608, %s28_s18, [#allocation6], %s345_s19, %s345_s19, %s346_s20  }
   0x8   :  { %337 = dma.done.wait [#allocation3], 128  }
   0x9   :  { %338 = vsyncadd [#allocation3], 4294967168 }
   0xa   :  { %339 = dma.done.wait [#allocation6], 4608  }
   0xb   :  { %340 = vsyncadd [#allocation6], 4294962688  ;;  %v44_v0 = vld [vmem:[#allocation5 + $0x8] sm:$0xff]  ;;  %v43_v1 = vld [vmem:[#allocation5] sm:$0xff]  ;;  %vm45_vm0 = vcmask 130048   ;;  %v347_v3 = vmov 8.0  }
   0xc   :  { %63 = vmatpush.msra.mxu0 %v44_v0  ;;  %v42_v2 = vld [vmem:[#allocation2] sm:$0xff]  ;;  %259 = vrcp.f32 %v347_v3  ;;  %v127_v12 = vld [vmem:[#allocation5 + $0x90] sm:$0xff]  ;;  %v126_v14 = vld [vmem:[#allocation5 + $0x88] sm:$0xff]  ;;  %s348_s0 = smov [#allocation7]   ;;  %s240_s23 = sshll.u32 %s393_s2, 4  ;;  %s241_s23 = int_to_ptr.hbm [resolvable:$true] %s240_s23 }
   0xd   :  { %v128_v9 = vld [vmem:[#allocation5 + $0x98] sm:$0xff]  ;;  %v125_v17 = vld [vmem:[#allocation5 + $0x80] sm:$0xff]  ;;  %v123_v22 = vld [vmem:[#allocation5 + $0x70] sm:$0xff]  ;;  %s238_s1 = sshll.u32 %s348_s0, 4  ;;  %s239_s1 = int_to_ptr.vmem [resolvable:$true] %s238_s1 }
   0xe   :  { %64 = vmatpush.msra.mxu0 %v43_v1  ;;  %129 = vmatpush.msra.mxu1 %v128_v9  ;;  %v124_v19 = vld [vmem:[#allocation5 + $0x78] sm:$0xff]  ;;  %v122_v24 = vld [vmem:[#allocation5 + $0x68] sm:$0xff]  ;;  %v121_v26 = vld [vmem:[#allocation5 + $0x60] sm:$0xff] }
   0xf   :  { %251 = vmatmul.msk.f32.vlgmr.msra.gmra.mxu0 %vm45_vm0, %v42_v2  ;;  %v120_v28 = vld [vmem:[#allocation5 + $0x58] sm:$0xff]  ;;  %v119_v30 = vld [vmem:[#allocation5 + $0x50] sm:$0xff]  ;;  %v118_v32 = vld [vmem:[#allocation5 + $0x48] sm:$0xff] }
  0x10   :  { %130 = vmatpush.msra.mxu1 %v127_v12  ;;  %v117_v34 = vld [vmem:[#allocation5 + $0x40] sm:$0xff]  ;;  %v116_v36 = vld [vmem:[#allocation5 + $0x38] sm:$0xff]  ;;  %v115_v37 = vld [vmem:[#allocation5 + $0x30] sm:$0xff] }
  0x11   :  { %v114_v39 = vld [vmem:[#allocation5 + $0x28] sm:$0xff]  ;;  %v113_v41 = vld [vmem:[#allocation5 + $0x20] sm:$0xff]  ;;  %v92_v49 = vld [vmem:[#allocation5 + $0x10] sm:$0x1] }
  0x12   :  { %v260_v4 = vpop.eup %259  ;;  %131 = vmatpush.msra.mxu1 %v126_v14  ;;  %v105_v53 = vld [vmem:[#allocation5 + $0x11] sm:$0x1]  ;;  %v201_v63 = vld [vmem:[#allocation5 + $0x118] sm:$0xff]  ;;  %v199_v3 = vld [vmem:[#allocation5 + $0x108] sm:$0xff] }
  0x13   :  { %v76_v5 = vmul.f32 8.0, %v260_v4  ;;  %vm80_vm1 = vweird.f32 %v260_v4  ;;  %204 = vmatpush.msra.mxu2 %v201_v63  ;;  %v200_v1 = vld [vmem:[#allocation5 + $0x110] sm:$0xff] }
  0x14   :  { %132 = vmatpush.msra.mxu1 %v125_v17  ;;  %v196_v9 = vld [vmem:[#allocation5 + $0xf0] sm:$0xff] }
  0x15   :  { %v77_v6 = vsub.f32 1.0, %v76_v5  ;;  %205 = vmatpush.msra.mxu2 %v200_v1  ;;  %v198_v5 = vld [vmem:[#allocation5 + $0x100] sm:$0xff]  ;;  %v192_v17 = vld [vmem:[#allocation5 + $0xd0] sm:$0xff] }
  0x16   :  { %133 = vmatpush.msra.mxu1 %v124_v19  ;;  %v191_v19 = vld [vmem:[#allocation5 + $0xc8] sm:$0xff] }
  0x17   :  { %v78_v10 = vmul.f32 %v260_v4, %v77_v6  ;;  %206 = vmatpush.msra.mxu2 %v199_v3 }
  0x18   :  { %134 = vmatpush.msra.mxu1 %v123_v22  ;;  %v190_v22 = vld [vmem:[#allocation5 + $0xc0] sm:$0xff] }
  0x19   :  { %v79_v15 = vadd.f32 %v260_v4, %v78_v10  ;;  %207 = vmatpush.msra.mxu2 %v198_v5 }
  0x1a   :  { %135 = vmatpush.msra.mxu1 %v122_v24  ;;  %v189_v24 = vld [vmem:[#allocation5 + $0xb8] sm:$0xff] }
  0x1b   :  { %v374_v20 = vsel %vm80_vm1, %v260_v4, %v79_v15  ;;  %v193_v15 = vld [vmem:[#allocation5 + $0xd8] sm:$0xff] }
  0x1c   :  { %136 = vmatpush.msra.mxu1 %v121_v26 }
  0x1e   :  { %137 = vmatpush.msra.mxu1 %v120_v28 }
  0x20   :  { %138 = vmatpush.msra.mxu1 %v119_v30 }
  0x22   :  { %139 = vmatpush.msra.mxu1 %v118_v32 }
  0x24   :  { %140 = vmatpush.msra.mxu1 %v117_v34 }
  0x26   :  { %141 = vmatpush.msra.mxu1 %v116_v36 }
  0x28   :  { %142 = vmatpush.msra.mxu1 %v115_v37  ;;  %v165_v37 = vld [vmem:[#allocation5 + $0x12] sm:$0x1] }
  0x2a   :  { %143 = vmatpush.msra.mxu1 %v114_v39 }
  0x2c   :  { %144 = vmatpush.msra.mxu1 %v113_v41  ;;  %v178_v41 = vld [vmem:[#allocation5 + $0x13] sm:$0x1] }
  0x8c   :  { %v370_v7 = vpop.f32.mrf.mxu0 }
  0x8d   :  { %v69_v8 = vrot.slane %v370_v7, 4 }
  0x8f   :  { %v70_v11 = vadd.f32 %v69_v8, %v370_v7 }
  0x91   :  { %v71_v13 = vrot.slane %v70_v11, 2 }
  0x93   :  { %v72_v16 = vadd.f32 %v71_v13, %v70_v11  ;;  %v195_v11 = vld [vmem:[#allocation5 + $0xe8] sm:$0xff]  ;;  %v194_v13 = vld [vmem:[#allocation5 + $0xe0] sm:$0xff] }
  0x95   :  { %v73_v18 = vrot.slane %v72_v16, 1 }
  0x97   :  { %v74_v21 = vadd.f32 %v73_v18, %v72_v16 }
  0x99   :  { %v82_v23 = vmul.f32 %v374_v20, %v74_v21 }
  0x9b   :  { %v83_v25 = vsub.f32 %v370_v7, %v82_v23 }
  0x9d   :  { %v84_v27 = vmul.f32 %v83_v25, %v83_v25  ;;  %v188_v25 = vld [vmem:[#allocation5 + $0xb0] sm:$0xff] }
  0x9f   :  { %v85_v29 = vrot.slane %v84_v27, 4 }
  0xa1   :  { %v86_v31 = vadd.f32 %v85_v29, %v84_v27  ;;  %v187_v27 = vld [vmem:[#allocation5 + $0xa8] sm:$0xff]  ;;  %v186_v29 = vld [vmem:[#allocation5 + $0xa0] sm:$0xff] }
  0xa3   :  { %v87_v33 = vrot.slane %v86_v31, 2 }
  0xa5   :  { %v88_v35 = vadd.f32 %v87_v33, %v86_v31 }
  0xa7   :  { %v89_v38 = vrot.slane %v88_v35, 1 }
  0xa9   :  { %v90_v40 = vadd.f32 %v89_v38, %v88_v35 }
  0xab   :  { %v91_v42 = vmul.f32 %v90_v40, %v374_v20 }
  0xad   :  { %v93_v43 = vadd.f32 1e-05, %v91_v42 }
  0xaf   :  { %261 = vrsqrt.f32 %v93_v43  ;;  %vm100_vm3 = vweird.f32 %v93_v43 }
  0xb5   :  { %v262_v44 = vpop.eup %261 }
  0xb6   :  { %v95_v45 = vmul.f32 %v262_v44, %v93_v43  ;;  %vm101_vm2 = vweird.f32 %v262_v44 }
  0xb7   :  { %vm102_vm4 = vmor %vm100_vm3, %vm101_vm2 }
  0xb8   :  { %v96_v46 = vmul.f32 %v262_v44, %v95_v45 }
  0xba   :  { %v97_v47 = vmul.f32 0.5, %v96_v46 }
  0xbc   :  { %v98_v48 = vsub.f32 1.5, %v97_v47 }
  0xbe   :  { %v99_v50 = vmul.f32 %v262_v44, %v98_v48  ;;  %v224_v48 = vlaneseq }
  0xc0   :  { %v103_v51 = vsel %vm102_vm4, %v262_v44, %v99_v50  ;;  %v225_v50 = vand.u32 127, %v224_v48 }
  0xc1   :  { %v104_v52 = vmul.f32 %v103_v51, %v92_v49  ;;  %v258_v49 = vld [vmem:[#allocation5 + $0x18] ss:$0 sm:$0xff] }
  0xc2   :  { %vm226_vm8 = vcmp.ge.s32.totalorder %v225_v50, 1  ;;  %vm227_vm9 = vcmp.lt.s32.totalorder %v225_v50, 2 }
  0xc3   :  { %v108_v54 = vperm.slane %v104_v52, 0  ;;  %v106_v55 = vmul.f32 %v104_v52, %v82_v23  ;;  %vm228_vm10 = vmand %vm226_vm8, %vm227_vm9 }
  0xc5   :  { %v107_v56 = vsub.f32 %v105_v53, %v106_v55  ;;  %v109_v57 = vmul.f32 %v108_v54, %v370_v7  ;;  %v197_v7 = vld [vmem:[#allocation5 + $0xf8] sm:$0xff] }
  0xc6   :  { %208 = vmatpush.msra.mxu2 %v197_v7 }
  0xc7   :  { %v110_v58 = vperm.slane %v107_v56, 0 }
  0xc8   :  { %209 = vmatpush.msra.mxu2 %v196_v9 }
  0xc9   :  { %v111_v59 = vadd.f32 %v110_v58, %v109_v57 }
  0xca   :  { %210 = vmatpush.msra.mxu2 %v195_v11 }
  0xcb   :  { %v112_v60 = vmax.f32 %v111_v59, 0.0 }
  0xcc   :  { %211 = vmatpush.msra.mxu2 %v194_v13 }
  0xcd   :  { %145 = vmatmul.f32.vlgmr.msra.gmra.mxu1 %v112_v60 }
  0xce   :  { %212 = vmatpush.msra.mxu2 %v193_v15 }
  0xd0   :  { %213 = vmatpush.msra.mxu2 %v192_v17 }
  0xd2   :  { %214 = vmatpush.msra.mxu2 %v191_v19 }
  0xd4   :  { %215 = vmatpush.msra.mxu2 %v190_v22 }
  0xd6   :  { %216 = vmatpush.msra.mxu2 %v189_v24 }
  0xd8   :  { %217 = vmatpush.msra.mxu2 %v188_v25 }
  0xda   :  { %218 = vmatpush.msra.mxu2 %v187_v27 }
  0xdc   :  { %219 = vmatpush.msra.mxu2 %v186_v29 }
 0x14a   :  { %v380_v61 = vpop.f32.mrf.mxu1 }
 0x14b   :  { %v149_v62 = vrot.slane %v380_v61, 4 }
 0x14d   :  { %v150_v0 = vadd.f32 %v149_v62, %v380_v61 }
 0x14f   :  { %v151_v2 = vrot.slane %v150_v0, 2 }
 0x151   :  { %v152_v4 = vadd.f32 %v151_v2, %v150_v0 }
 0x153   :  { %v153_v6 = vrot.slane %v152_v4, 1 }
 0x155   :  { %v154_v8 = vadd.f32 %v153_v6, %v152_v4 }
 0x157   :  { %v155_v10 = vmul.f32 %v154_v8, %v374_v20 }
 0x159   :  { %v156_v12 = vsub.f32 %v380_v61, %v155_v10 }
 0x15b   :  { %v157_v14 = vmul.f32 %v156_v12, %v156_v12 }
 0x15d   :  { %v158_v16 = vrot.slane %v157_v14, 4 }
 0x15f   :  { %v159_v18 = vadd.f32 %v158_v16, %v157_v14 }
 0x161   :  { %v160_v21 = vrot.slane %v159_v18, 2 }
 0x163   :  { %v161_v23 = vadd.f32 %v160_v21, %v159_v18 }
 0x165   :  { %v162_v26 = vrot.slane %v161_v23, 1 }
 0x167   :  { %v163_v28 = vadd.f32 %v162_v26, %v161_v23 }
 0x169   :  { %v164_v30 = vmul.f32 %v163_v28, %v374_v20 }
 0x16b   :  { %v166_v31 = vadd.f32 1e-05, %v164_v30 }
 0x16d   :  { %263 = vrsqrt.f32 %v166_v31  ;;  %vm173_vm6 = vweird.f32 %v166_v31 }
 0x173   :  { %v264_v32 = vpop.eup %263 }
 0x174   :  { %v168_v33 = vmul.f32 %v264_v32, %v166_v31  ;;  %vm174_vm5 = vweird.f32 %v264_v32 }
 0x175   :  { %vm175_vm7 = vmor %vm173_vm6, %vm174_vm5 }
 0x176   :  { %v169_v34 = vmul.f32 %v264_v32, %v168_v33 }
 0x178   :  { %v170_v35 = vmul.f32 0.5, %v169_v34 }
 0x17a   :  { %v171_v36 = vsub.f32 1.5, %v170_v35 }
 0x17c   :  { %v172_v38 = vmul.f32 %v264_v32, %v171_v36 }
 0x17e   :  { %v176_v39 = vsel %vm175_vm7, %v264_v32, %v172_v38 }
 0x17f   :  { %v177_v40 = vmul.f32 %v176_v39, %v165_v37 }
 0x181   :  { %v181_v42 = vperm.slane %v177_v40, 0  ;;  %v179_v43 = vmul.f32 %v177_v40, %v155_v10 }
 0x183   :  { %v180_v44 = vsub.f32 %v178_v41, %v179_v43  ;;  %v182_v20 = vmul.f32 %v181_v42, %v380_v61 }
 0x185   :  { %v183_v45 = vperm.slane %v180_v44, 0 }
 0x187   :  { %v184_v46 = vadd.f32 %v183_v45, %v182_v20 }
 0x189   :  { %v185_v47 = vmax.f32 %v184_v46, 0.0 }
 0x18b   :  { %220 = vmatmul.f32.vlgmr.msra.gmra.mxu2 %v185_v47 }
 0x20e   :  { %v221_v51 = vpop.f32.mrf.mxu2 }
 0x20f   :  { %v222_v52 = vadd.f32 %v258_v49, %v221_v51 }
 0x211   :  { %v229_v53 = vmax.f32 %v222_v52, -20.0 }
 0x213   :  { %v230_v54 = vmin.f32 %v229_v53, 2.0 }
 0x215   :  { %v231_v55 = vsel %vm228_vm10, %v230_v54, %v222_v52 }
 0x216   :  { %232 = vst [vmem:[#allocation7] sm:$0xff] %v231_v55 }
 0x217   :  { %243 = dma.vmem_to_hbm [thread:$0]  %s239_s1, 128, %s241_s23, [#allocation4]  }
 0x218   :  { %341 = dma.done.wait [#allocation4], 128  }
 0x219   :  { %342 = vsyncadd [#allocation4], 4294967168 }
 0x21a   :  { %248 = vsyncpa [#allocation3], 1 }
 0x21b   :  { %249 = vsyncpa [#allocation6], 1 }
 0x21c   :  { %250 = vsyncpa [#allocation4], 1 }

</bundles_post_ra>
